<compile_context>
chip_gen: v6e
topology: v6e:2x2x1
jax: 0.10.0
libtpu: 0.0.40
codegen_flags: <defaults>
</compile_context>

<pallas_src>
import functools
import math

import jax
import jax.numpy as jnp
from jax.experimental import pallas as pl
from jax.experimental.pallas import tpu as pltpu


def _round_up(x, m):
    return ((x + m - 1) // m) * m


def _cdiv(a, b):
    return -(-a // b)


def _default_bf16_epilogue():
    """bf16 VPU path exists on v6e/v7x; fall back to f32 elementwise on <= v5."""
    try:
        kind = jax.devices()[0].device_kind.lower()
    except Exception:  # pragma: no cover - be permissive if query fails
        return True
    return not any(old in kind for old in ("v2", "v3", "v4", "v5"))


def _choose_tiling(batch, block_b):
    """Pick (rows per grid step, grid length).

    Small batches -> a single grid step (per-step overhead ~0.35 us dominates
    the ~0.2-0.3 us of compute here). Large batches -> an even number of row
    tiles so both v7x TensorCores get equal work. Tile rows are always a
    multiple of 8 (sublane constraint)."""
    b_aligned = _round_up(max(batch, 1), 8)
    block_b = max(8, _round_up(block_b, 8))
    if b_aligned <= block_b:
        return b_aligned, 1
    n_tiles = _cdiv(b_aligned, block_b)
    if n_tiles % 2:
        n_tiles += 1                      # even split across 2 TCs on v7x
    tb = _round_up(_cdiv(b_aligned, n_tiles), 8)
    return tb, n_tiles


def _actor_kernel(x_ref, w1_ref, b1_ref, w2_ref, b2_ref, w3_ref, b3_ref, o_ref,
                  *, bf16_epilogue):
    # One batch tile per grid step. Weights/biases (bf16) are VMEM-resident
    # across steps; GEMMs run on the MXU with f32 accumulation.
    x = x_ref[...].astype(jnp.bfloat16)

    h1 = jnp.dot(x, w1_ref[...], preferred_element_type=jnp.float32)
    if bf16_epilogue:
        h1 = jnp.maximum(h1.astype(jnp.bfloat16) + b1_ref[...], 0)          # bf16 VPU
    else:
        h1 = jnp.maximum(h1 + b1_ref[...].astype(jnp.float32), 0.0).astype(jnp.bfloat16)

    h2 = jnp.dot(h1, w2_ref[...], preferred_element_type=jnp.float32)
    if bf16_epilogue:
        h2 = jnp.maximum(h2.astype(jnp.bfloat16) + b2_ref[...], 0)          # bf16 VPU
    else:
        h2 = jnp.maximum(h2 + b2_ref[...].astype(jnp.float32), 0.0).astype(jnp.bfloat16)

    y = jnp.dot(h2, w3_ref[...], preferred_element_type=jnp.float32) + b3_ref[...]
    o_ref[...] = (jnp.tanh(y) * jnp.float32(math.pi)).astype(o_ref.dtype)   # EUP tanh


@functools.partial(jax.jit, static_argnames=("out_size", "block_b", "bf16_epilogue"))
def actor_forward(state, params, *, out_size, block_b=512, bf16_epilogue=True):
    """state: (B, input_size) f32. params: dict from init_actor_params (fc3 is
    pre-padded to a 128-lane width). Returns (B, out_size) f32 actions in
    (-pi, pi)."""
    w1, b1, w2, b2, w3, b3 = (params[k] for k in ("w1", "b1", "w2", "b2", "w3", "b3"))
    B, in_size = state.shape
    hidden = w1.shape[1]
    out_pad = w3.shape[1]          # fc3 already lane-dense (padded at init time)

    tb, n_tiles = _choose_tiling(B, block_b)
    b_pad = tb * n_tiles
    x_p = state if b_pad == B else jnp.pad(state, ((0, b_pad - B), (0, 0)))

    const = lambda shape: pl.BlockSpec(shape, lambda i: (0, 0))  # VMEM-resident operand

    flops = 2 * b_pad * (in_size * hidden + hidden * hidden + hidden * out_pad)
    bytes_accessed = (
        x_p.size * x_p.dtype.itemsize
        + sum(int(p.size) * p.dtype.itemsize for p in (w1, b1, w2, b2, w3, b3))
        + b_pad * out_pad * 4                                    # f32 output slab
    )

    out = pl.pallas_call(
        functools.partial(_actor_kernel, bf16_epilogue=bf16_epilogue),
        out_shape=jax.ShapeDtypeStruct((b_pad, out_pad), jnp.float32),
        grid=(n_tiles,),
        in_specs=[
            pl.BlockSpec((tb, in_size), lambda i: (i, 0)),       # batch tile of state
            const(w1.shape), const(b1.shape),
            const(w2.shape), const(b2.shape),
            const(w3.shape), const(b3.shape),
        ],
        out_specs=pl.BlockSpec((tb, out_pad), lambda i: (i, 0)),
        compiler_params=pltpu.CompilerParams(
            dimension_semantics=("parallel",),                   # both TCs on v7x
        ),
        cost_estimate=pl.CostEstimate(
            flops=flops,
            transcendentals=b_pad * out_pad,                     # tanh
            bytes_accessed=bytes_accessed,
        ),
    )(x_p, w1, b1, w2, b2, w3, b3)

    # Lane-dense padded store inside the kernel; slice the real action columns
    # (and any padded batch rows) back out here. With out_size=4 a masked-store
    # variant (out_shape last dim = out_size) is the alternative to benchmark.
    return out[:B, :out_size]


def init_actor_params(key, input_size, output_size, hidden=256):
    """Deterministic init mimicking PyTorch nn.Linear (uniform +-1/sqrt(fan_in)).

    Weights are (in, out) bf16 MXU operands; b1/b2 are bf16 (added to the bf16
    epilogue), b3 is f32 (added to the f32 accumulator before tanh). fc3 is
    padded to a 128-lane output ONCE here so the forward pass never pads it."""
    out_pad = _round_up(output_size, 128)
    ks = jax.random.split(key, 6)

    def lin(kw, kb, fan_in, fan_out):
        bound = 1.0 / math.sqrt(fan_in)
        w = jax.random.uniform(kw, (fan_in, fan_out), jnp.float32, -bound, bound)
        b = jax.random.uniform(kb, (1, fan_out), jnp.float32, -bound, bound)
        return w, b

    w1, b1 = lin(ks[0], ks[1], input_size, hidden)
    w2, b2 = lin(ks[2], ks[3], hidden, hidden)
    w3, b3 = lin(ks[4], ks[5], hidden, output_size)
    w3 = jnp.pad(w3, ((0, 0), (0, out_pad - output_size)))
    b3 = jnp.pad(b3, ((0, 0), (0, out_pad - output_size)))
    return {
        "w1": w1.astype(jnp.bfloat16), "b1": b1.astype(jnp.bfloat16),
        "w2": w2.astype(jnp.bfloat16), "b2": b2.astype(jnp.bfloat16),
        "w3": w3.astype(jnp.bfloat16), "b3": b3,
    }


def actor_forward_ref(state, params, *, out_size, bf16_epilogue=True):
    """Pure-JAX reference using the same bf16-operand / f32-accumulate scheme."""
    def mm(a, w):
        return jnp.dot(a.astype(jnp.bfloat16), w, preferred_element_type=jnp.float32)

    if bf16_epilogue:
        ep = lambda h, b: jnp.maximum(h.astype(jnp.bfloat16) + b, 0)
    else:
        ep = lambda h, b: jnp.maximum(h + b.astype(jnp.float32), 0.0).astype(jnp.bfloat16)

    h1 = ep(mm(state, params["w1"]), params["b1"])
    h2 = ep(mm(h1, params["w2"]), params["b2"])
    y = mm(h2, params["w3"]) + params["b3"]
    out = jnp.tanh(y) * jnp.float32(math.pi)
    return out[:, :out_size]


if __name__ == "__main__":
    key = jax.random.PRNGKey(0)
    k_params, k_state, k_big = jax.random.split(key, 3)

    input_size = 8     # state dim
    output_size = 4    # action dim
    batch = 2

    params = init_actor_params(k_params, input_size, output_size)
    bf16_ep = _default_bf16_epilogue()

    # Small-batch check (matches the module's typical single-step actor call):
    # collapses to a single grid step.
    state = jax.random.normal(k_state, (batch, input_size), jnp.float32)
    out = jax.block_until_ready(
        actor_forward(state, params, out_size=output_size, bf16_epilogue=bf16_ep))
    ref = actor_forward_ref(state, params, out_size=output_size, bf16_epilogue=bf16_ep)
    assert out.shape == (batch, output_size)
    assert jnp.allclose(out, ref, atol=2e-3, rtol=2e-3), "mismatch vs JAX reference"
    assert bool(jnp.all(jnp.abs(out) <= math.pi + 1e-3)), "output outside (-pi, pi)"

    # Batched path: exercises multi-tile grid (even #tiles, 8-aligned rows,
    # non-multiple batch padding).
    big_state = jax.random.normal(k_big, (300, input_size), jnp.float32)
    out_big = jax.block_until_ready(
        actor_forward(big_state, params, out_size=output_size, block_b=128,
                      bf16_epilogue=bf16_ep))
    ref_big = actor_forward_ref(big_state, params, out_size=output_size,
                                bf16_epilogue=bf16_ep)
    assert out_big.shape == (300, output_size)
    assert jnp.allclose(out_big, ref_big, atol=2e-3, rtol=2e-3), "batched mismatch"

    # TODO(synk): Actor.sample (rsample + Normal.log_prob + clamp) is stochastic
    # glue around the forward pass, not a hot path; intentionally left outside
    # the kernel.
    print("KERNEL_OK")
</pallas_src>

<mosaic_0001>
module attributes {stable_mosaic.version = 11 : i64} {
  func.func @_actor_kernel(%arg0: i32, %arg1: memref<8x8xf32, #tpu.memory_space<vmem>>, %arg2: memref<8x256xbf16, #tpu.memory_space<vmem>>, %arg3: memref<1x256xbf16, #tpu.memory_space<vmem>>, %arg4: memref<256x256xbf16, #tpu.memory_space<vmem>>, %arg5: memref<1x256xbf16, #tpu.memory_space<vmem>>, %arg6: memref<256x128xbf16, #tpu.memory_space<vmem>>, %arg7: memref<1x128xf32, #tpu.memory_space<vmem>>, %arg8: memref<8x128xf32, #tpu.memory_space<vmem>>) attributes {dimension_semantics = [#tpu.dimension_semantics<parallel>], iteration_bounds = array<i64: 1>, scalar_prefetch = 0 : i64, scratch_operands = 0 : i64, tpu.core_type = #tpu.core_type<tc>, window_params = [{transform_indices = @transform_0, window_bounds = array<i64: 8, 8>}, {pipeline_mode = #tpu.pipeline_mode<synchronous>, transform_indices = @transform_1, window_bounds = array<i64: 8, 256>}, {pipeline_mode = #tpu.pipeline_mode<synchronous>, transform_indices = @transform_2, window_bounds = array<i64: 1, 256>}, {pipeline_mode = #tpu.pipeline_mode<synchronous>, transform_indices = @transform_3, window_bounds = array<i64: 256, 256>}, {pipeline_mode = #tpu.pipeline_mode<synchronous>, transform_indices = @transform_4, window_bounds = array<i64: 1, 256>}, {pipeline_mode = #tpu.pipeline_mode<synchronous>, transform_indices = @transform_5, window_bounds = array<i64: 256, 128>}, {pipeline_mode = #tpu.pipeline_mode<synchronous>, transform_indices = @transform_6, window_bounds = array<i64: 1, 128>}, {transform_indices = @transform_7, window_bounds = array<i64: 8, 128>}]} {
    %c0 = arith.constant 0 : index
    %c0_0 = arith.constant 0 : index
    %0 = vector.load %arg1[%c0, %c0_0] : memref<8x8xf32, #tpu.memory_space<vmem>>, vector<8x8xf32>
    %1 = arith.truncf %0 : vector<8x8xf32> to vector<8x8xbf16>
    %c0_1 = arith.constant 0 : index
    %c0_2 = arith.constant 0 : index
    %2 = vector.load %arg2[%c0_1, %c0_2] : memref<8x256xbf16, #tpu.memory_space<vmem>>, vector<8x256xbf16>
    %cst = arith.constant dense<0.000000e+00> : vector<8x256xf32>
    %3 = tpu.matmul %1, %2, %cst {dimension_numbers = #tpu.dot_dimension_numbers<[1], [0], [0], [1], [0, 0, 1, 1], [], []>} : vector<8x8xbf16>, vector<8x256xbf16>, vector<8x256xf32> -> vector<8x256xf32>
    %4 = arith.truncf %3 : vector<8x256xf32> to vector<8x256xbf16>
    %c0_3 = arith.constant 0 : index
    %c0_4 = arith.constant 0 : index
    %5 = vector.load %arg3[%c0_3, %c0_4] : memref<1x256xbf16, #tpu.memory_space<vmem>>, vector<1x256xbf16>
    %6 = vector.broadcast %5 : vector<1x256xbf16> to vector<8x256xbf16>
    %7 = arith.addf %4, %6 : vector<8x256xbf16>
    %cst_5 = arith.constant 0.000000e+00 : bf16
    %8 = vector.broadcast %cst_5 : bf16 to vector<8x256xbf16>
    %9 = arith.maximumf %7, %8 : vector<8x256xbf16>
    %c0_6 = arith.constant 0 : index
    %c0_7 = arith.constant 0 : index
    %10 = vector.load %arg4[%c0_6, %c0_7] : memref<256x256xbf16, #tpu.memory_space<vmem>>, vector<256x256xbf16>
    %cst_8 = arith.constant dense<0.000000e+00> : vector<8x256xf32>
    %11 = tpu.matmul %9, %10, %cst_8 {dimension_numbers = #tpu.dot_dimension_numbers<[1], [0], [0], [1], [0, 0, 1, 1], [], []>} : vector<8x256xbf16>, vector<256x256xbf16>, vector<8x256xf32> -> vector<8x256xf32>
    %12 = arith.truncf %11 : vector<8x256xf32> to vector<8x256xbf16>
    %c0_9 = arith.constant 0 : index
    %c0_10 = arith.constant 0 : index
    %13 = vector.load %arg5[%c0_9, %c0_10] : memref<1x256xbf16, #tpu.memory_space<vmem>>, vector<1x256xbf16>
    %14 = vector.broadcast %13 : vector<1x256xbf16> to vector<8x256xbf16>
    %15 = arith.addf %12, %14 : vector<8x256xbf16>
    %cst_11 = arith.constant 0.000000e+00 : bf16
    %16 = vector.broadcast %cst_11 : bf16 to vector<8x256xbf16>
    %17 = arith.maximumf %15, %16 : vector<8x256xbf16>
    %c0_12 = arith.constant 0 : index
    %c0_13 = arith.constant 0 : index
    %18 = vector.load %arg6[%c0_12, %c0_13] : memref<256x128xbf16, #tpu.memory_space<vmem>>, vector<256x128xbf16>
    %cst_14 = arith.constant dense<0.000000e+00> : vector<8x128xf32>
    %19 = tpu.matmul %17, %18, %cst_14 {dimension_numbers = #tpu.dot_dimension_numbers<[1], [0], [0], [1], [0, 0, 1, 1], [], []>} : vector<8x256xbf16>, vector<256x128xbf16>, vector<8x128xf32> -> vector<8x128xf32>
    %c0_15 = arith.constant 0 : index
    %c0_16 = arith.constant 0 : index
    %20 = vector.load %arg7[%c0_15, %c0_16] : memref<1x128xf32, #tpu.memory_space<vmem>>, vector<1x128xf32>
    %21 = vector.broadcast %20 : vector<1x128xf32> to vector<8x128xf32>
    %22 = arith.addf %19, %21 : vector<8x128xf32>
    %23 = math.tanh %22 : vector<8x128xf32>
    %cst_17 = arith.constant 3.14159274 : f32
    %24 = vector.broadcast %cst_17 : f32 to vector<8x128xf32>
    %25 = arith.mulf %23, %24 : vector<8x128xf32>
    %c0_18 = arith.constant 0 : index
    %c0_19 = arith.constant 0 : index
    %26 = vector.load %arg8[%c0_18, %c0_19] : memref<8x128xf32, #tpu.memory_space<vmem>>, vector<8x128xf32>
    tpu.vector_store %arg8[%c0_18, %c0_19], %25 {strides = array<i32>} : memref<8x128xf32, #tpu.memory_space<vmem>>, vector<8x128xf32>,
    return
  }
  func.func @transform_0(%arg0: i32) -> (i32, i32) {
    %c0_i32 = arith.constant 0 : i32
    %c0_i32_0 = arith.constant 0 : i32
    return %arg0, %c0_i32 : i32, i32
  }
  func.func @transform_1(%arg0: i32) -> (i32, i32) {
    %c0_i32 = arith.constant 0 : i32
    %c0_i32_0 = arith.constant 0 : i32
    %c0_i32_1 = arith.constant 0 : i32
    return %c0_i32, %c0_i32_0 : i32, i32
  }
  func.func @transform_2(%arg0: i32) -> (i32, i32) {
    %c0_i32 = arith.constant 0 : i32
    %c0_i32_0 = arith.constant 0 : i32
    %c0_i32_1 = arith.constant 0 : i32
    return %c0_i32, %c0_i32_0 : i32, i32
  }
  func.func @transform_3(%arg0: i32) -> (i32, i32) {
    %c0_i32 = arith.constant 0 : i32
    %c0_i32_0 = arith.constant 0 : i32
    %c0_i32_1 = arith.constant 0 : i32
    return %c0_i32, %c0_i32_0 : i32, i32
  }
  func.func @transform_4(%arg0: i32) -> (i32, i32) {
    %c0_i32 = arith.constant 0 : i32
    %c0_i32_0 = arith.constant 0 : i32
    %c0_i32_1 = arith.constant 0 : i32
    return %c0_i32, %c0_i32_0 : i32, i32
  }
  func.func @transform_5(%arg0: i32) -> (i32, i32) {
    %c0_i32 = arith.constant 0 : i32
    %c0_i32_0 = arith.constant 0 : i32
    %c0_i32_1 = arith.constant 0 : i32
    return %c0_i32, %c0_i32_0 : i32, i32
  }
  func.func @transform_6(%arg0: i32) -> (i32, i32) {
    %c0_i32 = arith.constant 0 : i32
    %c0_i32_0 = arith.constant 0 : i32
    %c0_i32_1 = arith.constant 0 : i32
    return %c0_i32, %c0_i32_0 : i32, i32
  }
  func.func @transform_7(%arg0: i32) -> (i32, i32) {
    %c0_i32 = arith.constant 0 : i32
    %c0_i32_0 = arith.constant 0 : i32
    return %arg0, %c0_i32 : i32, i32
  }
}

</mosaic_0001>

<bundles_post_ra>
// kernel: actor_forward.1
= control target key start
LH: loop header
LB: loop body
LE: loop exit
PB: predicated region body
PF: predicated region fallthrough
CT: control target
= control target key end

     0   :  { %12 = vsyncpa [#allocation3], 0  ;;  %s894_s0 = inlined_call_operand.vmem [shape: f32[8,8], index: 0, kind: input, shape index: {}]   ;;  %s895_s1 = inlined_call_operand.vmem [shape: bf16[8,256], index: 1, kind: input, shape index: {}]   ;;  %s896_s2 = inlined_call_operand.vmem [shape: bf16[1,256], index: 2, kind: input, shape index: {}]   ;;  %s897_s3 = inlined_call_operand.hbm [shape: bf16[256,256], index: 3, kind: input, shape index: {}]   ;;  %s898_s4 = inlined_call_operand.vmem [shape: bf16[1,256], index: 4, kind: input, shape index: {}]   ;;  %s899_s5 = inlined_call_operand.hbm [shape: bf16[256,128], index: 5, kind: input, shape index: {}]   ;;  %s900_s6 = inlined_call_operand.vmem [shape: f32[1,128], index: 6, kind: input, shape index: {}]   ;;  %s901_s7 = inlined_call_operand.vmem [shape: f32[8,128], index: 7, kind: output, shape index: {}]  }
   0x1   :  { %13 = vsyncpa [#allocation5], 0  ;;  %s817_s24 = smov [#allocation2]  }
   0x2   :  { %s25_s25 = sshll.u32 %s817_s24, 4  ;;  %s26_s25 = int_to_ptr.vmem [resolvable:$true] %s25_s25 }
   0x3   :  { %s781_s26 = scalar_lea.vmem %s26_s25, 4096  ;;  %p786_p1 = scmp.lt.s32.totalorder %s26_s25, %s26_s25 }
   0x4   :  { %p782_p0 = scmp.ne.s32.totalorder %s26_s25, %s781_s26  ;;  %p787_p2 = scmp.lt.s32.totalorder %s781_s26, %s781_s26 }
   0x6   :  { %p788_p3 = por %p787_p2, %p786_p1 }
   0x8   :  { %p789_p4 = pnand %p788_p3, %p782_p0 }
   0xa   :  { %792 = shalt.err (!%p789_p4)
}
   0xb   :  { %s818_s27 = smov 128   ;;  %s819_s28 = smov 8  }
   0xc   :  { %31 = dma.hbm_to_vmem [thread:$0]  %s897_s3, 4096, %s26_s25, [#allocation3], %s818_s27, %s818_s27, %s819_s28  }
   0xd   :  { %s820_s8 = smov [#allocation4]  }
   0xe   :  { %s39_s9 = sshll.u32 %s820_s8, 4  ;;  %s40_s9 = int_to_ptr.vmem [resolvable:$true] %s39_s9 }
   0xf   :  { %s801_s10 = scalar_lea.vmem %s40_s9, 2048  ;;  %p806_p6 = scmp.lt.s32.totalorder %s40_s9, %s40_s9 }
  0x10   :  { %p802_p5 = scmp.ne.s32.totalorder %s40_s9, %s801_s10  ;;  %p807_p7 = scmp.lt.s32.totalorder %s801_s10, %s801_s10 }
  0x12   :  { %p808_p8 = por %p807_p7, %p806_p6 }
  0x14   :  { %p809_p9 = pnand %p808_p8, %p802_p5 }
  0x16   :  { %812 = shalt.err (!%p809_p9)
}
  0x17   :  { %s821_s11 = smov 64   ;;  %s822_s12 = smov 4  }
  0x18   :  { %45 = dma.hbm_to_vmem [thread:$0]  %s899_s5, 2048, %s40_s9, [#allocation5], %s821_s11, %s821_s11, %s822_s12  }
  0x19   :  { %813 = dma.done.wait [#allocation3], 4096  }
  0x1a   :  { %814 = vsyncadd [#allocation3], 4294963200 }
  0x1b   :  { %815 = dma.done.wait [#allocation5], 2048  }
  0x1c   :  { %816 = vsyncadd [#allocation5], 4294965248  ;;  %v823_v0 = vmov 0   ;;  %v57_v1 = vld [vmem:[%s895_s1] sm:$0xff]  ;;  %vm67_vm0 = vcmask 1043456   ;;  %vm63_vm1 = vcmask 64512   ;;  %v130_v53 = vlaneseq }
  0x1d   :  { %106 = vmatprep.mubr.bf16.mxu0 %v823_v0  ;;  %v55_v2 = vld [vmem:[%s894_s0] sm:$0xff]  ;;  %v621_v3 = vcombine.high %v57_v1, %v57_v1  ;;  %v620_v4 = vcombine.low %v57_v1, %v57_v1  ;;  %v707_v5 = vld [vmem:[#allocation2 + $0x74] ss:$8 sps:$4 sm:$0xff]   ;;  %v709_v6 = vld [vmem:[#allocation2 + $0x70] ss:$8 sps:$4 sm:$0xff]  }
  0x1e   :  { %v710_v7 = vld [vmem:[#allocation2 + $0x64] ss:$8 sps:$4 sm:$0xff]   ;;  %v56_v9 = vpack.c.bf16 %v55_v2, %v55_v2  ;;  %351 = vmatprep.subr.bf16.mxu1 %v707_v5  ;;  %v712_v10 = vld [vmem:[#allocation2 + $0x60] ss:$8 sps:$4 sm:$0xff]   ;;  %v713_v11 = vld [vmem:[#allocation2 + $0x54] ss:$8 sps:$4 sm:$0xff]  }
  0x1f   :  { %622 = vmatprep.subr.msk.bf16.mxu0 %vm67_vm0, %v621_v3  ;;  %v69_v8 = vsel %vm67_vm0, %v620_v4, 0  ;;  %352 = vmatpush1.bf16.msra.mxu1 %v709_v6  ;;  %v715_v12 = vld [vmem:[#allocation2 + $0x50] ss:$8 sps:$4 sm:$0xff]   ;;  %v716_v13 = vld [vmem:[#allocation2 + $0x44] ss:$8 sps:$4 sm:$0xff]   ;;  %v131_v55 = vshrl.u32 %v130_v53, 7 }
  0x20   :  { %89 = vmatpush1.bf16.msra.mxu0 %v69_v8  ;;  %353 = vmatprep.subr.bf16.mxu1 %v710_v7  ;;  %v718_v14 = vld [vmem:[#allocation2 + $0x40] ss:$8 sps:$4 sm:$0xff]   ;;  %v719_v15 = vld [vmem:[#allocation2 + $0x34] ss:$8 sps:$4 sm:$0xff]   ;;  %v721_v16 = vld [vmem:[#allocation2 + $0x30] ss:$8 sps:$4 sm:$0xff]  }
  0x21   :  { %v722_v17 = vld [vmem:[#allocation2 + $0x24] ss:$8 sps:$4 sm:$0xff]   ;;  %v724_v18 = vld [vmem:[#allocation2 + $0x20] ss:$8 sps:$4 sm:$0xff]   ;;  %v725_v19 = vld [vmem:[#allocation2 + $0x14] ss:$8 sps:$4 sm:$0xff]  }
  0x22   :  { %v727_v20 = vld [vmem:[#allocation2 + $0x10] ss:$8 sps:$4 sm:$0xff]   ;;  %v728_v21 = vld [vmem:[#allocation2 + $0x4] ss:$8 sps:$4 sm:$0xff]   ;;  %v730_v22 = vld [vmem:[#allocation2] ss:$8 sps:$4 sm:$0xff]  }
  0x23   :  { %623 = vmatmul.mubr.msk.bf16.vlgmr.msra.gmra.mxu0 %vm63_vm1, %v56_v9  ;;  %354 = vmatpush1.bf16.msra.mxu1 %v712_v10  ;;  %v731_v23 = vld [vmem:[#allocation2 + $0xf4] ss:$8 sps:$4 sm:$0xff]   ;;  %v733_v24 = vld [vmem:[#allocation2 + $0xf0] ss:$8 sps:$4 sm:$0xff]   ;;  %v734_v25 = vld [vmem:[#allocation2 + $0xe4] ss:$8 sps:$4 sm:$0xff]  }
  0x24   :  { %355 = vmatprep.subr.bf16.mxu1 %v713_v11  ;;  %v736_v26 = vld [vmem:[#allocation2 + $0xe0] ss:$8 sps:$4 sm:$0xff]   ;;  %v737_v27 = vld [vmem:[#allocation2 + $0xd4] ss:$8 sps:$4 sm:$0xff]   ;;  %v739_v28 = vld [vmem:[#allocation2 + $0xd0] ss:$8 sps:$4 sm:$0xff]  }
  0x25   :  { %v740_v29 = vld [vmem:[#allocation2 + $0xc4] ss:$8 sps:$4 sm:$0xff]   ;;  %v742_v30 = vld [vmem:[#allocation2 + $0xc0] ss:$8 sps:$4 sm:$0xff]   ;;  %v743_v31 = vld [vmem:[#allocation2 + $0xb4] ss:$8 sps:$4 sm:$0xff]  }
  0x26   :  { %v745_v32 = vld [vmem:[#allocation2 + $0xb0] ss:$8 sps:$4 sm:$0xff]   ;;  %v746_v33 = vld [vmem:[#allocation2 + $0xa4] ss:$8 sps:$4 sm:$0xff]   ;;  %v748_v34 = vld [vmem:[#allocation2 + $0xa0] ss:$8 sps:$4 sm:$0xff]  }
  0x27   :  { %356 = vmatpush1.bf16.msra.mxu1 %v715_v12  ;;  %v749_v35 = vld [vmem:[#allocation2 + $0x94] ss:$8 sps:$4 sm:$0xff]   ;;  %v751_v36 = vld [vmem:[#allocation2 + $0x90] ss:$8 sps:$4 sm:$0xff]   ;;  %v752_v37 = vld [vmem:[#allocation2 + $0x84] ss:$8 sps:$4 sm:$0xff]  }
  0x28   :  { %357 = vmatprep.subr.bf16.mxu1 %v716_v13  ;;  %v754_v38 = vld [vmem:[#allocation2 + $0x80] ss:$8 sps:$4 sm:$0xff]   ;;  %v755_v39 = vld [vmem:[#allocation4 + $0x78] sm:$0xff]   ;;  %v757_v41 = vld [vmem:[#allocation4 + $0x70] sm:$0xff]   ;;  %v824_v51 = vmov 1966171168  }
  0x29   :  { %v756_v40 = vld [vmem:[#allocation4 + $0x38] sm:$0xff]   ;;  %675 = vmatprep.subr.bf16.mxu0 %v755_v39  ;;  %v758_v42 = vld [vmem:[#allocation4 + $0x30] sm:$0xff]   ;;  %v759_v43 = vld [vmem:[#allocation4 + $0x68] sm:$0xff]   ;;  %v128_v52 = vunpack.c.l.s4 %v824_v51  ;;  %v146_v62 = vsub.s32 0, %v131_v55 }
  0x2a   :  { %676 = vmatpush3.bf16.msra.mxu0 %v756_v40  ;;  %v760_v44 = vld [vmem:[#allocation4 + $0x28] sm:$0xff]   ;;  %v761_v45 = vld [vmem:[#allocation4 + $0x60] sm:$0xff]   ;;  %v763_v47 = vld [vmem:[#allocation4 + $0x58] sm:$0xff]  }
  0x2b   :  { %358 = vmatpush1.bf16.msra.mxu1 %v718_v14  ;;  %677 = vmatprep.subr.bf16.mxu0 %v757_v41  ;;  %v762_v46 = vld [vmem:[#allocation4 + $0x20] sm:$0xff]   ;;  %v764_v48 = vld [vmem:[#allocation4 + $0x18] sm:$0xff]   ;;  %v765_v49 = vld [vmem:[#allocation4 + $0x50] sm:$0xff]   ;;  %v129_v54 = vunpack.c.0.s8 %v128_v52 }
  0x2c   :  { %359 = vmatprep.subr.bf16.mxu1 %v719_v15  ;;  %v766_v50 = vld [vmem:[#allocation4 + $0x10] sm:$0xff]   ;;  %v624_v56 = vld.sshfl [vmem:[%s896_s2] sm:$0x11 pattern:$0x75316420]  ;;  %v767_v13 = vld [vmem:[#allocation4 + $0x48] sm:$0xff]  }
  0x2d   :  { %v132_v57 = vsub.s32 %v129_v54, %v131_v55  ;;  %v126_v58 = vcombine.high %v624_v56, %v624_v56  ;;  %v768_v14 = vld [vmem:[#allocation4 + $0x8] sm:$0xff]   ;;  %v769_v15 = vld [vmem:[#allocation4 + $0x40] sm:$0xff]  }
  0x2e   :  { %678 = vmatpush3.bf16.msra.mxu0 %v758_v42 }
  0x2f   :  { %360 = vmatpush1.bf16.msra.mxu1 %v721_v16  ;;  %679 = vmatprep.subr.bf16.mxu0 %v759_v43  ;;  %v133_v59 = vrot.slane %v624_v56, %v132_v57  ;;  %v140_v60 = vrot.slane %v126_v58, %v132_v57  ;;  %v770_v16 = vld [vmem:[#allocation4] sm:$0xff]  }
  0x30   :  { %361 = vmatprep.subr.bf16.mxu1 %v722_v17  ;;  %v657_v17 = vld.sshfl [vmem:[%s898_s4] sm:$0x11 pattern:$0x75316420] }
  0x31   :  { %v142_v61 = vpack.i.b16 %v133_v59, %v133_v59  ;;  %v149_v63 = vpack.i.b16 %v140_v60, %v140_v60 }
  0x32   :  { %680 = vmatpush3.bf16.msra.mxu0 %v760_v44 }
  0x33   :  { %362 = vmatpush1.bf16.msra.mxu1 %v724_v18  ;;  %681 = vmatprep.subr.bf16.mxu0 %v761_v45  ;;  %v147_v2 = vrot.slane %v142_v61, %v146_v62  ;;  %v154_v4 = vrot.slane %v149_v63, %v146_v62  ;;  %v403_v18 = vcombine.high %v657_v17, %v657_v17 }
  0x34   :  { %363 = vmatprep.subr.bf16.mxu1 %v725_v19  ;;  %v410_v19 = vrot.slane %v657_v17, %v132_v57 }
  0x36   :  { %682 = vmatpush3.bf16.msra.mxu0 %v762_v46 }
  0x37   :  { %364 = vmatpush1.bf16.msra.mxu1 %v727_v20  ;;  %683 = vmatprep.subr.bf16.mxu0 %v763_v47  ;;  %v417_v20 = vrot.slane %v403_v18, %v132_v57 }
  0x38   :  { %365 = vmatprep.subr.bf16.mxu1 %v728_v21  ;;  %v419_v21 = vpack.i.b16 %v410_v19, %v410_v19 }
  0x3a   :  { %684 = vmatpush3.bf16.msra.mxu0 %v764_v48 }
  0x3b   :  { %366 = vmatpush1.bf16.msra.mxu1 %v730_v22  ;;  %685 = vmatprep.subr.bf16.mxu0 %v765_v49  ;;  %v426_v22 = vpack.i.b16 %v417_v20, %v417_v20 }
  0x3c   :  { %367 = vmatprep.subr.bf16.mxu1 %v731_v23 }
  0x3e   :  { %686 = vmatpush3.bf16.msra.mxu0 %v766_v50 }
  0x3f   :  { %368 = vmatpush2.bf16.msra.mxu1 %v733_v24  ;;  %687 = vmatprep.subr.bf16.mxu0 %v767_v13  ;;  %v424_v24 = vrot.slane %v419_v21, %v146_v62 }
  0x40   :  { %369 = vmatprep.subr.bf16.mxu1 %v734_v25 }
  0x42   :  { %688 = vmatpush3.bf16.msra.mxu0 %v768_v14 }
  0x43   :  { %370 = vmatpush2.bf16.msra.mxu1 %v736_v26  ;;  %689 = vmatprep.subr.bf16.mxu0 %v769_v15  ;;  %v431_v26 = vrot.slane %v426_v22, %v146_v62 }
  0x44   :  { %371 = vmatprep.subr.bf16.mxu1 %v737_v27 }
  0x46   :  { %690 = vmatpush3.bf16.msra.mxu0 %v770_v16 }
  0x47   :  { %372 = vmatpush2.bf16.msra.mxu1 %v739_v28 }
  0x48   :  { %373 = vmatprep.subr.bf16.mxu1 %v740_v29 }
  0x4b   :  { %374 = vmatpush2.bf16.msra.mxu1 %v742_v30 }
  0x4c   :  { %375 = vmatprep.subr.bf16.mxu1 %v743_v31 }
  0x4f   :  { %376 = vmatpush2.bf16.msra.mxu1 %v745_v32 }
  0x50   :  { %377 = vmatprep.subr.bf16.mxu1 %v746_v33 }
  0x53   :  { %378 = vmatpush2.bf16.msra.mxu1 %v748_v34 }
  0x54   :  { %379 = vmatprep.subr.bf16.mxu1 %v749_v35 }
  0x57   :  { %380 = vmatpush2.bf16.msra.mxu1 %v751_v36  ;;  %v658_v36 = vld [vmem:[%s900_s6] ss:$0 sm:$0xff] }
  0x58   :  { %381 = vmatprep.subr.bf16.mxu1 %v752_v37 }
  0x5b   :  { %382 = vmatpush2.bf16.msra.mxu1 %v754_v38 }
  0xe3   :  { %v108_v1 = vpop.f32.mrf.mxu0 }
  0xe4   :  { %v115_v3 = vpack.c.bf16 %v108_v1, %v108_v1 }
  0xe5   :  { %v110_v5 = vpop.f32.mrf.mxu0 }
  0xe6   :  { %v116_v6 = vpack.c.bf16 %v110_v5, %v110_v5  ;;  %v155_v7 = vadd.bf16 %v147_v2, %v115_v3 }
  0xe7   :  { %v112_v8 = vpop.f32.mrf.mxu0 }
  0xe8   :  { %v156_v9 = vadd.bf16 %v154_v4, %v116_v6  ;;  %v157_v12 = vmax.bf16 %v823_v0, %v155_v7 }
  0xe9   :  { %v113_v10 = vpop.f32.mrf.mxu0 }
  0xea   :  { %v158_v11 = vmax.bf16 %v823_v0, %v156_v9 }
  0xec   :  { %383 = vmatprep.mubr.bf16.mxu1 %v158_v11 }
  0xed   :  { %384 = vmatmul.mubr.bf16.vlgmr.msra.gmra.mxu1 %v157_v12 }
 0x1ad   :  { %v385_v23 = vpop.f32.mrf.mxu1 }
 0x1ae   :  { %v392_v25 = vpack.c.bf16 %v385_v23, %v385_v23 }
 0x1af   :  { %v387_v27 = vpop.f32.mrf.mxu1 }
 0x1b0   :  { %v393_v28 = vpack.c.bf16 %v387_v27, %v387_v27  ;;  %v432_v29 = vadd.bf16 %v424_v24, %v392_v25 }
 0x1b1   :  { %v389_v30 = vpop.f32.mrf.mxu1 }
 0x1b2   :  { %v433_v31 = vadd.bf16 %v431_v26, %v393_v28  ;;  %v434_v34 = vmax.bf16 %v823_v0, %v432_v29 }
 0x1b3   :  { %v390_v32 = vpop.f32.mrf.mxu1 }
 0x1b4   :  { %v435_v33 = vmax.bf16 %v823_v0, %v433_v31 }
 0x1b6   :  { %603 = vmatprep.mubr.bf16.mxu0 %v435_v33 }
 0x1b7   :  { %604 = vmatmul.mubr.bf16.vlgmr.msra.gmra.mxu0 %v434_v34 }
 0x277   :  { %v691_v35 = vpop.f32.mrf.mxu0 }
 0x279   :  { %v692_v37 = vpop.f32.mrf.mxu0 }
 0x27a   :  { %v693_v38 = vadd.f32 %v692_v37, %v691_v35 }
 0x27b   :  { %v694_v39 = vpop.f32.mrf.mxu0 }
 0x27c   :  { %v606_v40 = vadd.f32 %v693_v38, %v658_v36 }
 0x27d   :  { %v695_v41 = vpop.f32.mrf.mxu0 }
 0x27e   :  { %771 = vtanh.f32 %v606_v40 }
 0x28b   :  { %v772_v42 = vpop.eup %771 }
 0x28c   :  { %v612_v43 = vmul.f32 3.1415927, %v772_v42 }
 0x28e   :  { %613 = vst [vmem:[%s901_s7] sm:$0xff] %v612_v43 }
 0x28f   :  { %618 = vsyncpa [#allocation3], 1 }
 0x290   :  { %619 = vsyncpa [#allocation5], 1 }

</bundles_post_ra>
